<compile_context>
chip_gen: v5e
topology: v5e:2x2
jax: 0.10.0
libtpu: 0.0.40
codegen_flags: <defaults>
</compile_context>

<pallas_src>
import jax
import jax.numpy as jnp
from jax.experimental import pallas as pl
from jax.experimental.pallas import tpu as pltpu


def _round_up(x, m):
    return ((x + m - 1) // m) * m


def _logreg_kernel(x_ref, w_ref, b_ref, o_ref):
    # x_ref: (tm, K) VMEM, w_ref: (K, r) VMEM, b_ref: (1,) SMEM, o_ref: (tm, r) VMEM
    x = x_ref[...].astype(jnp.float32)
    w = w_ref[...].astype(jnp.float32)
    logits = jnp.dot(x, w, preferred_element_type=jnp.float32) + b_ref[0]  # MXU
    o_ref[...] = jax.nn.sigmoid(logits).astype(o_ref.dtype)


def _vmem_budget_bytes():
    # Generation-aware scoped-VMEM budget: ~70% of physical VMEM, capped at
    # 48 MiB (v5e/v6e have 128 MiB -> 48 MiB; v7x has 64 MiB -> ~44 MiB).
    try:
        cap = pltpu.get_tpu_info().vmem_capacity_bytes
    except Exception:
        cap = 64 * 1024 * 1024  # conservative fallback works on every generation
    return int(min(48 * 1024 * 1024, (cap * 7) // 10))


def _choose_block_rows(rows, row_bytes_raw, row_bytes_padded, sublane, vmem_limit):
    if rows <= sublane:
        return rows                       # single full-extent block (always legal)
    # ~4 MiB of raw HBM bytes per grid step: multi-MiB tiles amortize the
    # ~0.35 us per-step overhead and reach the 85%+ HBM-roofline regime.
    tm = (4 * 1024 * 1024) // max(1, row_bytes_raw)
    # Lane-padded VMEM accounting: 2x double-buffered x tile + f32 upcast temp
    # + weight/output blocks must stay well under the scoped budget.
    tm = min(tm, (vmem_limit // 5) // max(1, row_bytes_padded))
    # v7x megacore: keep >= 4 grid steps on the "parallel" batch axis, but never
    # shrink a step below ~1 MiB of raw bytes (no effect on v5e/v6e, 1 TC).
    min_rows = (1 * 1024 * 1024) // max(1, row_bytes_raw)
    tm = min(tm, max(min_rows, pl.cdiv(rows, 4)))
    # dtype-aware sublane multiple (8 f32, 16 bf16, 32 int8/fp8).
    tm = max(sublane, (tm // sublane) * sublane)
    if tm >= rows:
        tm = rows                         # exact full-dim block, no overhang
    return tm


def logistic_regression_forward(x, weight, bias):
    """x: (B, N), weight: (1, N), bias: (1,) -> (B,) float32 probabilities."""
    B, N = x.shape
    itemsize = jnp.dtype(x.dtype).itemsize
    sublane = max(8, 32 // itemsize)      # 8 for f32, 16 for bf16, 32 for int8

    w_flat = weight.reshape(-1).astype(jnp.float32)

    # Lane-dense repack: fold r = 128 // N consecutive samples into each
    # 128-lane row (free contiguous reshape in HBM) and use a block-diagonal
    # (128, r) weight so one MXU matmul emits r logits per VMEM row.
    r = 1
    if N < 128 and 128 % N == 0 and B >= (128 // N) and B % (128 // N) == 0:
        r = 128 // N

    if r > 1:
        rows, width = B // r, r * N                           # width == 128
        x_in = x.reshape(rows, width)
        w_in = jnp.kron(jnp.eye(r, dtype=jnp.float32), w_flat.reshape(N, 1))
    else:
        rows, width = B, N
        x_in = x
        w_in = w_flat.reshape(N, 1)

    vmem_limit = _vmem_budget_bytes()
    row_bytes_raw = width * itemsize
    row_bytes_padded = _round_up(width, 128) * itemsize
    tm = _choose_block_rows(rows, row_bytes_raw, row_bytes_padded, sublane,
                            vmem_limit)

    out = pl.pallas_call(
        _logreg_kernel,
        grid=(pl.cdiv(rows, tm),),          # ragged last block, no jnp.pad copy
        out_shape=jax.ShapeDtypeStruct((rows, r), jnp.float32),
        in_specs=[
            pl.BlockSpec((tm, width), lambda i: (i, 0)),         # streamed x tiles
            pl.BlockSpec((w_in.shape[0], r), lambda i: (0, 0)),  # resident weight
            pl.BlockSpec(memory_space=pltpu.MemorySpace.SMEM),   # bias scalar
        ],
        out_specs=pl.BlockSpec((tm, r), lambda i: (i, 0)),
        compiler_params=pltpu.CompilerParams(
            dimension_semantics=("parallel",),
            vmem_limit_bytes=vmem_limit,
        ),
    )(x_in, w_in, bias.reshape(1).astype(jnp.float32))

    # torch's .squeeze() on (B, 1) logits -> (B,); the packed path unfolds the
    # r samples per row back into original sample order.
    return out.reshape(-1)[:B]


def _reference(x, weight, bias):
    return jax.nn.sigmoid(
        x.astype(jnp.float32) @ weight.T.astype(jnp.float32)
        + bias.astype(jnp.float32)).reshape(-1)


if __name__ == "__main__":
    key = jax.random.PRNGKey(0)
    k_x, k_w, k_b, k_x2, k_x3 = jax.random.split(key, 5)

    N = 32
    # Deterministic parameter init matching nn.Linear's U(-1/sqrt(n), 1/sqrt(n)).
    bound = 1.0 / (N ** 0.5)
    weight = jax.random.uniform(k_w, (1, N), jnp.float32, minval=-bound, maxval=bound)
    bias = jax.random.uniform(k_b, (1,), jnp.float32, minval=-bound, maxval=bound)

    # Small batch: single lane-packed tile (rows = B*N/128 = 2).
    B = 8
    x = jax.random.normal(k_x, (B, N), jnp.float32)
    y = jax.block_until_ready(logistic_regression_forward(x, weight, bias))
    assert y.shape == (B,)
    assert jnp.allclose(y, _reference(x, weight, bias), atol=1e-5, rtol=1e-5)

    # Larger batch on the lane-packed path (rows = 75, not a sublane multiple).
    B2 = 300
    x2 = jax.random.normal(k_x2, (B2, N), jnp.float32)
    y2 = jax.block_until_ready(logistic_regression_forward(x2, weight, bias))
    assert y2.shape == (B2,)
    assert jnp.allclose(y2, _reference(x2, weight, bias), atol=1e-5, rtol=1e-5)

    # Batch not divisible by the packing factor: exercises the (B, N) fallback.
    B3 = 10
    x3 = jax.random.normal(k_x3, (B3, N), jnp.float32)
    y3 = jax.block_until_ready(logistic_regression_forward(x3, weight, bias))
    assert y3.shape == (B3,)
    assert jnp.allclose(y3, _reference(x3, weight, bias), atol=1e-5, rtol=1e-5)

    print("KERNEL_OK")
</pallas_src>

<mosaic_0001>
module attributes {stable_mosaic.version = 11 : i64} {
  func.func @_logreg_kernel(%arg0: i32, %arg1: memref<2x128xf32, #tpu.memory_space<vmem>>, %arg2: memref<128x4xf32, #tpu.memory_space<vmem>>, %arg3: memref<1xf32, #tpu.memory_space<smem>>, %arg4: memref<2x4xf32, #tpu.memory_space<vmem>>) attributes {dimension_semantics = [#tpu.dimension_semantics<parallel>], iteration_bounds = array<i64: 1>, scalar_prefetch = 0 : i64, scratch_operands = 0 : i64, tpu.core_type = #tpu.core_type<tc>, window_params = [{transform_indices = @transform_0, window_bounds = array<i64: 2, 128>}, {pipeline_mode = #tpu.pipeline_mode<synchronous>, transform_indices = @transform_1, window_bounds = array<i64: 128, 4>}, {transform_indices = @transform_2, window_bounds = array<i64: 1>}, {transform_indices = @transform_3, window_bounds = array<i64: 2, 4>}]} {
    %c0 = arith.constant 0 : index
    %c0_0 = arith.constant 0 : index
    %0 = vector.load %arg1[%c0, %c0_0] : memref<2x128xf32, #tpu.memory_space<vmem>>, vector<2x128xf32>
    %c0_1 = arith.constant 0 : index
    %c0_2 = arith.constant 0 : index
    %1 = vector.load %arg2[%c0_1, %c0_2] : memref<128x4xf32, #tpu.memory_space<vmem>>, vector<128x4xf32>
    %cst = arith.constant dense<0.000000e+00> : vector<2x4xf32>
    %2 = tpu.matmul %0, %1, %cst {dimension_numbers = #tpu.dot_dimension_numbers<[1], [0], [0], [1], [0, 0, 1, 1], [], []>} : vector<2x128xf32>, vector<128x4xf32>, vector<2x4xf32> -> vector<2x4xf32>
    %c0_3 = arith.constant 0 : index
    %3 = memref.load %arg3[%c0_3] : memref<1xf32, #tpu.memory_space<smem>>
    %4 = vector.broadcast %3 : f32 to vector<2x4xf32>
    %5 = arith.addf %2, %4 : vector<2x4xf32>
    %6 = arith.negf %5 : vector<2x4xf32>
    %7 = math.exp %6 : vector<2x4xf32>
    %cst_4 = arith.constant 1.000000e+00 : f32
    %8 = vector.broadcast %cst_4 : f32 to vector<2x4xf32>
    %9 = arith.addf %8, %7 : vector<2x4xf32>
    %10 = arith.divf %8, %9 : vector<2x4xf32>
    %c0_5 = arith.constant 0 : index
    %c0_6 = arith.constant 0 : index
    %11 = vector.load %arg4[%c0_5, %c0_6] : memref<2x4xf32, #tpu.memory_space<vmem>>, vector<2x4xf32>
    tpu.vector_store %arg4[%c0_5, %c0_6], %10 {strides = array<i32>} : memref<2x4xf32, #tpu.memory_space<vmem>>, vector<2x4xf32>,
    return
  }
  func.func @transform_0(%arg0: i32) -> (i32, i32) {
    %c0_i32 = arith.constant 0 : i32
    %c0_i32_0 = arith.constant 0 : i32
    return %arg0, %c0_i32 : i32, i32
  }
  func.func @transform_1(%arg0: i32) -> (i32, i32) {
    %c0_i32 = arith.constant 0 : i32
    %c0_i32_0 = arith.constant 0 : i32
    %c0_i32_1 = arith.constant 0 : i32
    return %c0_i32, %c0_i32_0 : i32, i32
  }
  func.func @transform_2(%arg0: i32) -> i32 {
    %c0_i32 = arith.constant 0 : i32
    %c0_i32_0 = arith.constant 0 : i32
    return %c0_i32 : i32
  }
  func.func @transform_3(%arg0: i32) -> (i32, i32) {
    %c0_i32 = arith.constant 0 : i32
    %c0_i32_0 = arith.constant 0 : i32
    return %arg0, %c0_i32 : i32, i32
  }
}

</mosaic_0001>

<bundles_post_ra>
// kernel: tpu_custom_call.1
= control target key start
LH: loop header
LB: loop body
LE: loop exit
PB: predicated region body
PF: predicated region fallthrough
CT: control target
= control target key end

     0   :  { %s202_s0 = inlined_call_operand.vmem [shape: f32[2,128], index: 0, kind: input, shape index: {}]   ;;  %s203_s1 = inlined_call_operand.vmem [shape: f32[128,4], index: 1, kind: input, shape index: {}]   ;;  %s204_s2 = inlined_call_operand.<no memory space> [shape: f32[1], index: 2, kind: input, shape index: {}]   ;;  %s205_s3 = inlined_call_operand.hbm [shape: f32[2,4], index: 3, kind: output, shape index: {}]  }
   0x1   :  { %v32_v0 = vld [vmem:[%s203_s1 + $0x78] sm:$0xff]  ;;  %v31_v1 = vld [vmem:[%s203_s1 + $0x70] sm:$0xff]  ;;  %v30_v2 = vld [vmem:[%s203_s1 + $0x68] sm:$0xff] }
   0x2   :  { %35 = vmatpush.msra.mxu0 %v32_v0  ;;  %v29_v3 = vld [vmem:[%s203_s1 + $0x60] sm:$0xff] }
   0x4   :  { %36 = vmatpush.msra.mxu0 %v31_v1 }
   0x6   :  { %37 = vmatpush.msra.mxu0 %v30_v2 }
   0x7   :  { %9 = vsyncpa [#allocation4], 0  ;;  %v28_v4 = vld [vmem:[%s203_s1 + $0x58] sm:$0xff]  ;;  %v27_v5 = vld [vmem:[%s203_s1 + $0x50] sm:$0xff]  ;;  %v34_v17 = vstv %s204_s2  ;;  %s83_s2 = sshll.u32 %s205_s3, 4  ;;  %vm74_vm3 = vcmask 25600   ;;  %s84_s2 = int_to_ptr.hbm [resolvable:$true] %s83_s2 }
   0x8   :  { %38 = vmatpush.msra.mxu0 %v29_v3  ;;  %v26_v6 = vld [vmem:[%s203_s1 + $0x48] sm:$0xff]  ;;  %v25_v7 = vld [vmem:[%s203_s1 + $0x40] sm:$0xff]  ;;  %v24_v8 = vld [vmem:[%s203_s1 + $0x38] sm:$0xff] }
   0x9   :  { %v23_v9 = vld [vmem:[%s203_s1 + $0x30] sm:$0xff]  ;;  %v22_v10 = vld [vmem:[%s203_s1 + $0x28] sm:$0xff]  ;;  %v21_v11 = vld [vmem:[%s203_s1 + $0x20] sm:$0xff] }
   0xa   :  { %39 = vmatpush.msra.mxu0 %v28_v4  ;;  %v20_v12 = vld [vmem:[%s203_s1 + $0x18] sm:$0xff]  ;;  %v19_v13 = vld [vmem:[%s203_s1 + $0x10] sm:$0xff]  ;;  %v18_v14 = vld [vmem:[%s203_s1 + $0x8] sm:$0xff] }
   0xb   :  { %v17_v15 = vld [vmem:[%s203_s1] sm:$0xff] }
   0xc   :  { %40 = vmatpush.msra.mxu0 %v27_v5  ;;  %v16_v16 = vld [vmem:[%s202_s0] sm:$0x3]  ;;  %s124_s0 = smov [#allocation3]  }
   0xd   :  { %s81_s1 = sshll.u32 %s124_s0, 4  ;;  %s82_s1 = int_to_ptr.vmem [resolvable:$true] %s81_s1 }
   0xe   :  { %41 = vmatpush.msra.mxu0 %v26_v6 }
  0x10   :  { %42 = vmatpush.msra.mxu0 %v25_v7 }
  0x12   :  { %43 = vmatpush.msra.mxu0 %v24_v8 }
  0x14   :  { %44 = vmatpush.msra.mxu0 %v23_v9 }
  0x16   :  { %45 = vmatpush.msra.mxu0 %v22_v10 }
  0x18   :  { %46 = vmatpush.msra.mxu0 %v21_v11 }
  0x1a   :  { %47 = vmatpush.msra.mxu0 %v20_v12 }
  0x1c   :  { %48 = vmatpush.msra.mxu0 %v19_v13 }
  0x1e   :  { %49 = vmatpush.msra.mxu0 %v18_v14 }
  0x20   :  { %50 = vmatpush.msra.mxu0 %v17_v15 }
  0x21   :  { %51 = vmatmul.f32.vlgmr.msra.gmra.mxu0 %v16_v16 }
  0x9e   :  { %v52_v18 = vpop.f32.mrf.mxu0 }
  0x9f   :  { %v53_v19 = vadd.f32 %v52_v18, %v34_v17 }
  0xa1   :  { %v92_v20 = vmul.f32 -1.442695, %v53_v19 }
  0xa3   :  { %94 = vpow2.f32 %v92_v20 }
  0xa9   :  { %v95_v21 = vpop.eup %94 }
  0xaa   :  { %v58_v22 = vadd.f32 1.0, %v95_v21 }
  0xac   :  { %96 = vrcp.f32 %v58_v22  ;;  %v70_v26 = vand.u32 2147483648, %v58_v22  ;;  %v68_v28 = vand.u32 2147483647, %v58_v22  ;;  %vm64_vm1 = vweird.f32 %v58_v22 }
  0xae   :  { %v71_v30 = vor.u32 1.1754944e-38, %v70_v26  ;;  %vm69_vm4 = vcmp.eq.f32.partialorder %v68_v28, 8.507059e+37 }
  0xb2   :  { %v97_v23 = vpop.eup %96 }
  0xb3   :  { %v60_v24 = vmul.f32 %v97_v23, %v58_v22  ;;  %vm65_vm0 = vweird.f32 %v97_v23 }
  0xb4   :  { %vm66_vm2 = vmor %vm64_vm1, %vm65_vm0 }
  0xb5   :  { %v61_v25 = vsub.f32 1.0, %v60_v24 }
  0xb7   :  { %v62_v27 = vmul.f32 %v97_v23, %v61_v25 }
  0xb9   :  { %v63_v29 = vadd.f32 %v97_v23, %v62_v27 }
  0xbb   :  { %v67_v31 = vsel %vm66_vm2, %v97_v23, %v63_v29 }
  0xbc   :  { %v72_v32 = vsel %vm69_vm4, %v71_v30, %v67_v31 }
  0xbd   :  { %75 = vst.msk [vmem:[#allocation3] sm:$0x3] %vm74_vm3, %v72_v32 }
  0xbe   :  { %86 = dma.vmem_to_hbm [thread:$0]  %s82_s1, 32, %s84_s2, [#allocation4]  }
  0xbf   :  { %122 = dma.done.wait [#allocation4], 32  }
  0xc0   :  { %123 = vsyncadd [#allocation4], 4294967264 }
  0xc1   :  { %91 = vsyncpa [#allocation4], 1 }

</bundles_post_ra>
